<compile_context>
chip_gen: v6e
topology: v6e:2x2x1
jax: 0.10.0
libtpu: 0.0.40
codegen_flags: <defaults>
</compile_context>

<pallas_src>
import math
from functools import partial

import numpy as np
import jax
import jax.numpy as jnp
from jax.experimental import pallas as pl
from jax.experimental.pallas import tpu as pltpu


def _round_up(x, m):
    return ((x + m - 1) // m) * m


# ----------------------------------------------------------------------------
# Deterministic parameter construction (mirrors init_kernel in the module).
# ----------------------------------------------------------------------------
def init_stft_kernel(frame_len, num_fft=None, window="sqrt_hann"):
    """Returns the conv kernel K2d of shape (num_fft + 2, num_fft), float32.

    Rows [0, F)   : cos(2*pi*f*k/nfft) * win[k]    (real rows)
    Rows [F, 2F)  : -sin(2*pi*f*k/nfft) * win[k]   (imag rows)
    Matches torch.fft.rfft(eye(nfft)) stacked real/imag, periodic hann window.
    """
    if not num_fft:
        fft_size = 2 ** math.ceil(math.log2(frame_len))
    else:
        fft_size = num_fft

    n = np.arange(frame_len, dtype=np.float64)
    hann = 0.5 * (1.0 - np.cos(2.0 * np.pi * n / frame_len))   # periodic hann
    if window == "povey":
        win = hann ** 0.85
    elif window == "sqrt_hann":
        win = hann ** 0.5
    elif window == "hann":
        win = hann
    else:
        raise RuntimeError(f"unsupported window {window}")

    left_pad = (fft_size - frame_len) // 2
    right_pad = left_pad + (fft_size - frame_len) % 2
    win = np.pad(win, (left_pad, right_pad))

    f_bins = fft_size // 2 + 1
    k = np.arange(fft_size, dtype=np.float64)
    f = np.arange(f_bins, dtype=np.float64)
    ang = 2.0 * np.pi * np.outer(f, k) / fft_size              # (F, nfft)
    real = np.cos(ang) * win[None, :]
    imag = -np.sin(ang) * win[None, :]
    return np.concatenate([real, imag], axis=0).astype(np.float32)  # (nfft+2, nfft)


def _pack_dft_kernel(k2d, num_fft, frame_hop):
    """Repack K2d as a flat (2*F_pad, R*hop) matrix.

    F is padded to a multiple of 8 (zero rows between real/imag halves) so the
    real/imag split of the accumulator is sublane-aligned; the column axis is
    padded from nfft to R*hop (zero columns) so it matches the in-kernel
    frames^T built from R hop-sized chunks.
    """
    f_bins = num_fft // 2 + 1
    f_pad = _round_up(f_bins, 8)
    r_chunks = -(-num_fft // frame_hop)                        # ceil(nfft / hop)
    k_cols = r_chunks * frame_hop
    k_flat = np.zeros((2 * f_pad, k_cols), dtype=np.float32)
    k_flat[:f_bins, :num_fft] = k2d[:f_bins]                   # real rows
    k_flat[f_pad:f_pad + f_bins, :num_fft] = k2d[f_bins:]      # imag rows
    return k_flat, f_pad, r_chunks


# ----------------------------------------------------------------------------
# Pallas kernel: one (T-tile, batch) block.
# ----------------------------------------------------------------------------
def _stft_tile_kernel(*refs, r_chunks, tile_t, f_bins, f_pad, has_halo):
    # main_ref: (1, hop, tile_t)        hop-chunks of the signal, T on lanes
    # halo_ref: (1, hop, halo_lanes)    chunk columns just past the tile (if any)
    # k_ref:    (2*F_pad, R*hop)        flat windowed-DFT matrix
    # m_ref/p_ref: (1, F, tile_t)
    if has_halo:
        main_ref, halo_ref, k_ref, m_ref, p_ref = refs
    else:
        main_ref, k_ref, m_ref, p_ref = refs

    main = main_ref[0]                                              # (hop, tile_t)
    if has_halo:
        buf = jnp.concatenate([main, halo_ref[0]], axis=-1)         # (hop, tile_t+halo)
        # frames^T: row r*hop + j == sample (t + r)*hop + j of the signal.
        frames_t = jnp.concatenate(
            [buf[:, r:r + tile_t] for r in range(r_chunks)], axis=0)  # (R*hop, tile_t)
    else:
        frames_t = main

    # Single fused MXU contraction over the whole (padded) frame length;
    # accumulation stays inside the MXU (f32 accumulator).
    acc = jnp.dot(k_ref[...], frames_t,
                  preferred_element_type=jnp.float32)               # (2*F_pad, tile_t)

    re = acc[:f_bins]                       # sublane-aligned starts (f_pad % 8 == 0)
    im = acc[f_pad:f_pad + f_bins]
    m_ref[0] = jnp.sqrt(re * re + im * im)
    # TODO(synk): if the atan2 epilogue ever becomes the binding VALU/EUP slot,
    # replace its exact divide with pl.reciprocal(approx=True) + quadrant fixup;
    # kept exact here to match torch.atan2 semantics.
    p_ref[0] = jnp.arctan2(im, re)


# ----------------------------------------------------------------------------
# Tiling / VMEM heuristics (per-generation).
# ----------------------------------------------------------------------------
def _default_vmem_limit_bytes():
    try:
        cap = int(pltpu.get_tpu_info().vmem_capacity_bytes)
    except Exception:
        cap = 64 * 1024 * 1024                     # conservative (covers v7x)
    # 96 MB on 128 MiB parts (v5e/v6e), ~48 MB on 64 MiB parts (v7x).
    return min(96 * 1024 * 1024, (cap * 3) // 4)


def _pick_tile_t(requested, t_frames, hop, f_pad, f_bins, r_chunks,
                 halo_lanes, in_itemsize, vmem_limit):
    step = halo_lanes                                # multiple of 128
    cap = _round_up(max(t_frames, 1), step)
    tile = _round_up(max(min(int(requested), cap), 128), step)
    tile = max(tile, step)

    k_bytes = 2 * f_pad * r_chunks * hop * in_itemsize          # single-buffered K

    def est(t):
        return (2 * hop * t * in_itemsize                        # main, double-buffered
                + 2 * hop * halo_lanes * in_itemsize             # halo, double-buffered
                + k_bytes
                + r_chunks * hop * t * in_itemsize               # frames^T temp
                + 6 * f_pad * t * 4                              # acc + epilogue temps
                + 4 * f_bins * t * 4)                            # 2 f32 outputs, dbl-buf

    budget = int(0.8 * vmem_limit)
    while tile > step and est(tile) > budget:
        tile -= step
    return tile


# ----------------------------------------------------------------------------
# Wrapper: padding / chunking glue in plain JAX, compute in Pallas.
# ----------------------------------------------------------------------------
def stft_forward(x, k2d, frame_hop, num_fft, *, tile_t=1024,
                 dot_dtype=jnp.bfloat16, vmem_limit_bytes=None):
    """x: (N, S) or (N, 1, S). Returns (m, p), each (N, F, T) float32."""
    if x.ndim == 3:
        if x.shape[1] != 1:
            raise RuntimeError(f"Expect single-channel input, got C={x.shape[1]}")
        x = x[:, 0, :]
    elif x.ndim != 2:
        raise RuntimeError(f"Expect 2D/3D tensor, got {x.ndim}D")
    x = x.astype(jnp.float32)

    n_batch = x.shape[0]
    nfft, hop = int(num_fft), int(frame_hop)
    pad = nfft // 2
    xp = jnp.pad(x, ((0, 0), (pad, pad)), mode="reflect")
    s_pad = xp.shape[-1]
    t_frames = (s_pad - nfft) // hop + 1
    f_bins = nfft // 2 + 1

    k_flat, f_pad, r_chunks = _pack_dft_kernel(np.asarray(k2d, np.float32), nfft, hop)
    k_cols = k_flat.shape[1]
    has_halo = r_chunks > 1
    halo_lanes = _round_up(max(r_chunks - 1, 1), 128)

    if vmem_limit_bytes is None:
        vmem_limit_bytes = _default_vmem_limit_bytes()
    in_itemsize = jnp.dtype(dot_dtype).itemsize
    tile_t = _pick_tile_t(tile_t, t_frames, hop, f_pad, f_bins, r_chunks,
                          halo_lanes, in_itemsize, vmem_limit_bytes)
    n_t = -(-t_frames // tile_t)
    t_pad = n_t * tile_t

    # Signal -> hop-sized chunk columns, T(chunks) on the lane axis.  The last
    # `halo_lanes` columns serve as an aligned halo view for every tile.
    n_chunks = t_pad + halo_lanes
    sig_len = n_chunks * hop
    if s_pad < sig_len:
        xp = jnp.pad(xp, ((0, 0), (0, sig_len - s_pad)))
    else:
        xp = xp[:, :sig_len]            # samples past the last frame: unused
    ct = jnp.transpose(xp.reshape(n_batch, n_chunks, hop), (0, 2, 1))   # (N, hop, n_chunks)
    ct = ct.astype(dot_dtype)
    kr = jnp.asarray(k_flat, dtype=dot_dtype)                           # (2*F_pad, R*hop)

    kern = partial(_stft_tile_kernel, r_chunks=r_chunks, tile_t=tile_t,
                   f_bins=f_bins, f_pad=f_pad, has_halo=has_halo)

    main_spec = pl.BlockSpec((1, hop, tile_t), lambda ti, b: (b, 0, ti))
    halo_step = tile_t // halo_lanes
    halo_spec = pl.BlockSpec((1, hop, halo_lanes),
                             lambda ti, b: (b, 0, (ti + 1) * halo_step))
    try:
        # The DFT matrix is grid-invariant: single-buffer it (halves its VMEM).
        k_spec = pl.BlockSpec((2 * f_pad, k_cols), lambda ti, b: (0, 0),
                              pipeline_mode=pl.Buffered(1))
    except TypeError:   # older JAX without pipeline_mode
        k_spec = pl.BlockSpec((2 * f_pad, k_cols), lambda ti, b: (0, 0))

    if has_halo:
        inputs = (ct, ct, kr)
        in_specs = [main_spec, halo_spec, k_spec]
    else:
        inputs = (ct, kr)
        in_specs = [main_spec, k_spec]

    out_spec = pl.BlockSpec((1, f_bins, tile_t), lambda ti, b: (b, 0, ti))

    # Cost estimate: K matrix is resident (counted once); atan2 expands to
    # roughly a handful of EUP/VALU transcendental-class ops per element.
    flops = 2 * n_batch * n_t * (2 * f_pad) * k_cols * tile_t
    transcendentals = 10 * n_batch * n_t * f_bins * tile_t
    bytes_accessed = (ct.size * in_itemsize
                      + (n_batch * n_t * hop * halo_lanes * in_itemsize if has_halo else 0)
                      + kr.size * in_itemsize
                      + 2 * n_batch * f_bins * t_frames * 4)

    m, p = pl.pallas_call(
        kern,
        out_shape=(
            jax.ShapeDtypeStruct((n_batch, f_bins, t_frames), jnp.float32),
            jax.ShapeDtypeStruct((n_batch, f_bins, t_frames), jnp.float32),
        ),
        grid=(n_t, n_batch),
        in_specs=in_specs,
        out_specs=(out_spec, out_spec),
        compiler_params=pltpu.CompilerParams(
            dimension_semantics=("parallel", "parallel"),
            vmem_limit_bytes=int(vmem_limit_bytes)),
        cost_estimate=pl.CostEstimate(
            flops=int(flops), transcendentals=int(transcendentals),
            bytes_accessed=int(bytes_accessed)),
    )(*inputs)
    return m, p


if __name__ == "__main__":
    key = jax.random.PRNGKey(0)

    # (frame_len, hop, nfft, batch, signal_len):
    #   cfg 1: nfft % hop == 0 (R=2);  cfg 2: nfft % hop != 0 (R=4, padded K cols).
    configs = [(32, 16, 32, 2, 128),
               (32, 10, 32, 2, 130)]

    for (frame_len, hop, nfft, n_batch, sig_len) in configs:
        key, sub = jax.random.split(key)
        x = jax.random.normal(sub, (n_batch, 1, sig_len), dtype=jnp.float32)
        k2d = init_stft_kernel(frame_len, num_fft=nfft, window="sqrt_hann")

        pad = nfft // 2
        t_frames = (sig_len + 2 * pad - nfft) // hop + 1
        f_bins = nfft // 2 + 1

        # Pure-JAX reference (framed matmul == conv1d path of the module).
        xr = jnp.pad(x[:, 0, :], ((0, 0), (pad, pad)), mode="reflect")
        idx = np.arange(t_frames)[:, None] * hop + np.arange(nfft)[None, :]
        frames = xr[:, idx]                                         # (N, T, nfft)
        c_ref = jnp.einsum("ntk,ok->not", frames, jnp.asarray(k2d)) # (N, 2F, T)
        r_ref, i_ref = c_ref[:, :f_bins], c_ref[:, f_bins:]
        m_ref = jnp.sqrt(r_ref * r_ref + i_ref * i_ref)

        for dot_dtype, atol, rtol in ((jnp.float32, 5e-3, 5e-3),
                                      (jnp.bfloat16, 5e-2, 2e-2)):
            m, p = stft_forward(x, k2d, hop, nfft, dot_dtype=dot_dtype)
            jax.block_until_ready((m, p))

            assert m.shape == (n_batch, f_bins, t_frames)
            assert p.shape == (n_batch, f_bins, t_frames)
            assert bool(jnp.all(jnp.isfinite(m))) and bool(jnp.all(jnp.isfinite(p)))
            assert bool(jnp.allclose(m, m_ref, atol=atol, rtol=rtol)), \
                f"magnitude mismatch ({dot_dtype}, nfft={nfft}, hop={hop})"
            assert bool(jnp.allclose(m * jnp.cos(p), r_ref, atol=atol, rtol=rtol)), \
                f"real-part mismatch ({dot_dtype}, nfft={nfft}, hop={hop})"
            assert bool(jnp.allclose(m * jnp.sin(p), i_ref, atol=atol, rtol=rtol)), \
                f"imag-part mismatch ({dot_dtype}, nfft={nfft}, hop={hop})"

    print("KERNEL_OK")
</pallas_src>

<mosaic_0001>
module attributes {stable_mosaic.version = 11 : i64} {
  func.func @_stft_tile_kernel(%arg0: i32, %arg1: i32, %arg2: memref<1x16x128xf32, #tpu.memory_space<vmem>>, %arg3: memref<1x16x128xf32, #tpu.memory_space<vmem>>, %arg4: memref<48x32xf32, #tpu.memory_space<vmem>>, %arg5: memref<1x17x128xf32, #tpu.memory_space<vmem>>, %arg6: memref<1x17x128xf32, #tpu.memory_space<vmem>>) attributes {dimension_semantics = [#tpu.dimension_semantics<parallel>, #tpu.dimension_semantics<parallel>], iteration_bounds = array<i64: 1, 2>, scalar_prefetch = 0 : i64, scratch_operands = 0 : i64, tpu.core_type = #tpu.core_type<tc>, window_params = [{transform_indices = @transform_0, window_bounds = array<i64: 1, 16, 128>}, {transform_indices = @transform_1, window_bounds = array<i64: 1, 16, 128>}, {pipeline_mode = #tpu.pipeline_mode<synchronous>, transform_indices = @transform_2, window_bounds = array<i64: 48, 32>}, {transform_indices = @transform_3, window_bounds = array<i64: 1, 17, 128>}, {transform_indices = @transform_4, window_bounds = array<i64: 1, 17, 128>}]} {
    %c0 = arith.constant 0 : index
    %c0_0 = arith.constant 0 : index
    %c0_1 = arith.constant 0 : index
    %0 = vector.load %arg2[%c0, %c0_0, %c0_1] : memref<1x16x128xf32, #tpu.memory_space<vmem>>, vector<1x16x128xf32>
    %1 = vector.shape_cast %0 : vector<1x16x128xf32> to vector<16x128xf32>
    %c0_2 = arith.constant 0 : index
    %c0_3 = arith.constant 0 : index
    %c0_4 = arith.constant 0 : index
    %2 = vector.load %arg3[%c0_2, %c0_3, %c0_4] : memref<1x16x128xf32, #tpu.memory_space<vmem>>, vector<1x16x128xf32>
    %3 = vector.shape_cast %2 : vector<1x16x128xf32> to vector<16x128xf32>
    %4 = tpu.concatenate %1, %3 in 1 : vector<16x128xf32>, vector<16x128xf32> -> vector<16x256xf32>
    %5 = vector.extract_strided_slice %4 {offsets = [0, 0], sizes = [16, 128], strides = [1, 1]} : vector<16x256xf32> to vector<16x128xf32>
    %6 = vector.extract_strided_slice %4 {offsets = [0, 1], sizes = [16, 128], strides = [1, 1]} : vector<16x256xf32> to vector<16x128xf32>
    %7 = tpu.concatenate %5, %6 in 0 : vector<16x128xf32>, vector<16x128xf32> -> vector<32x128xf32>
    %c0_5 = arith.constant 0 : index
    %c0_6 = arith.constant 0 : index
    %8 = vector.load %arg4[%c0_5, %c0_6] : memref<48x32xf32, #tpu.memory_space<vmem>>, vector<48x32xf32>
    %cst = arith.constant dense<0.000000e+00> : vector<48x128xf32>
    %9 = tpu.matmul %8, %7, %cst {dimension_numbers = #tpu.dot_dimension_numbers<[1], [0], [0], [1], [0, 0, 1, 1], [], []>} : vector<48x32xf32>, vector<32x128xf32>, vector<48x128xf32> -> vector<48x128xf32>
    %10 = vector.extract_strided_slice %9 {offsets = [0, 0], sizes = [17, 128], strides = [1, 1]} : vector<48x128xf32> to vector<17x128xf32>
    %11 = vector.extract_strided_slice %9 {offsets = [24, 0], sizes = [17, 128], strides = [1, 1]} : vector<48x128xf32> to vector<17x128xf32>
    %12 = arith.mulf %10, %10 : vector<17x128xf32>
    %13 = arith.mulf %11, %11 : vector<17x128xf32>
    %14 = arith.addf %12, %13 : vector<17x128xf32>
    %15 = math.sqrt %14 : vector<17x128xf32>
    %c0_7 = arith.constant 0 : index
    %c0_8 = arith.constant 0 : index
    %c0_9 = arith.constant 0 : index
    %16 = vector.load %arg5[%c0_7, %c0_8, %c0_9] : memref<1x17x128xf32, #tpu.memory_space<vmem>>, vector<1x17x128xf32>
    %17 = vector.shape_cast %16 : vector<1x17x128xf32> to vector<17x128xf32>
    %18 = vector.shape_cast %15 : vector<17x128xf32> to vector<1x17x128xf32>
    tpu.vector_store %arg5[%c0_7, %c0_8, %c0_9], %18 {strides = array<i32>} : memref<1x17x128xf32, #tpu.memory_space<vmem>>, vector<1x17x128xf32>,
    %19 = math.atan2 %11, %10 : vector<17x128xf32>
    %c0_10 = arith.constant 0 : index
    %c0_11 = arith.constant 0 : index
    %c0_12 = arith.constant 0 : index
    %20 = vector.load %arg6[%c0_10, %c0_11, %c0_12] : memref<1x17x128xf32, #tpu.memory_space<vmem>>, vector<1x17x128xf32>
    %21 = vector.shape_cast %20 : vector<1x17x128xf32> to vector<17x128xf32>
    %22 = vector.shape_cast %19 : vector<17x128xf32> to vector<1x17x128xf32>
    tpu.vector_store %arg6[%c0_10, %c0_11, %c0_12], %22 {strides = array<i32>} : memref<1x17x128xf32, #tpu.memory_space<vmem>>, vector<1x17x128xf32>,
    return
  }
  func.func @transform_0(%arg0: i32, %arg1: i32) -> (i32, i32, i32) {
    %c0_i32 = arith.constant 0 : i32
    %c0_i32_0 = arith.constant 0 : i32
    return %arg1, %c0_i32, %arg0 : i32, i32, i32
  }
  func.func @transform_1(%arg0: i32, %arg1: i32) -> (i32, i32, i32) {
    %c1_i32 = arith.constant 1 : i32
    %0 = arith.addi %arg0, %c1_i32 : i32
    %c1_i32_0 = arith.constant 1 : i32
    %1 = arith.muli %0, %c1_i32_0 : i32
    %c0_i32 = arith.constant 0 : i32
    %c0_i32_1 = arith.constant 0 : i32
    return %arg1, %c0_i32, %1 : i32, i32, i32
  }
  func.func @transform_2(%arg0: i32, %arg1: i32) -> (i32, i32) {
    %c0_i32 = arith.constant 0 : i32
    %c0_i32_0 = arith.constant 0 : i32
    %c0_i32_1 = arith.constant 0 : i32
    return %c0_i32, %c0_i32_0 : i32, i32
  }
  func.func @transform_3(%arg0: i32, %arg1: i32) -> (i32, i32, i32) {
    %c0_i32 = arith.constant 0 : i32
    %c0_i32_0 = arith.constant 0 : i32
    return %arg1, %c0_i32, %arg0 : i32, i32, i32
  }
  func.func @transform_4(%arg0: i32, %arg1: i32) -> (i32, i32, i32) {
    %c0_i32 = arith.constant 0 : i32
    %c0_i32_0 = arith.constant 0 : i32
    return %arg1, %c0_i32, %arg0 : i32, i32, i32
  }
}

</mosaic_0001>

<bundles_post_ra>
// kernel: tpu_custom_call.1
= control target key start
LH: loop header
LB: loop body
LE: loop exit
PB: predicated region body
PF: predicated region fallthrough
CT: control target
= control target key end

     0   :  { %10 = vsyncpa [#allocation4], 0  ;;  %s1311_s0 = inlined_call_operand.vmem [shape: f32[2,16,256], index: 0, kind: input, shape index: {}]   ;;  %s1312_s1 = inlined_call_operand.hbm [shape: f32[2,16,256], index: 1, kind: input, shape index: {}]   ;;  %s1313_s2 = inlined_call_operand.vmem [shape: f32[48,32], index: 2, kind: input, shape index: {}]   ;;  %s1314_s3 = inlined_call_operand.vmem [shape: f32[2,17,9], index: 3, kind: output, shape index: {0}]   ;;  %s1315_s4 = inlined_call_operand.vmem [shape: f32[2,17,9], index: 4, kind: output, shape index: {1}]  }
   0x1   :  { %12 = vsyncpa [#allocation4 + $0x1], 0  ;;  %s1046_s15 = smov 0   ;;  %s1048_s16 = smov 0  }
   0x2   :  { %s1050_s17 = smov 0   ;;  %s1052_s18 = smov 0  }
   0x3   :  { %s1054_s19 = smov 0   ;;  %s1056_s20 = smov 0  }
   0x4 LB: > { %s806_s21 = sadd.s32 4294967295, %s1012_s20   ;;  %s27_s22 = sadd.s32 1, %s1008_s19  ;;  %s1012_s20 = sphi %s1056_s20, %s18_s20   ;;  %s1008_s19 = sphi %s1054_s19, %s1322_s19   ;;  %s1004_s18 = sphi %s1052_s18, %s1321_s18   ;;  %s1000_s17 = sphi %s1050_s17, %s1320_s17   ;;  %s996_s16 = sphi %s1048_s16, %s1319_s16   ;;  %s992_s15 = sphi %s1046_s15, %s1318_s15  }
   0x5   : > { %p28_p0 = scmp.ge.s32.totalorder %s27_s22, 2  ;;  %s39_s23 = sadd.s32 1, %s1000_s17 }
   0x6   : > { %p46_p1 = scmp.ne.s32.totalorder %s1000_s17, %s996_s16  ;;  %p47_p2 = scmp.eq.s32.totalorder %s1012_s20, 0 }
   0x7   : > { %s1324_s22 = smov (%p28_p0, %s27_s22), 0  ;;  %p82_p4 = scmp.ne.s32.totalorder %s996_s16, %s992_s15 }
   0x8   : > { %p1082_p3 = por %p47_p2, %p46_p1  ;;  %s34_s25 = ssub.s32 %s1008_s19, %s1324_s22 }
   0x9   : > { %p83_p5 = scmp.eq.s32.totalorder %s806_s21, 0  ;;  %p37_p6 = scmp.eq.s32.totalorder %s34_s25, 0 }
   0xa   : > { %p809_p8 = scmp.ge.s32.totalorder %s1012_s20, 2 }
   0xb   : > { %p1089_p7 = por %p83_p5, %p82_p4 }
   0xc   : > { %s1094_s27 = scalar_select %p37_p6, %s1000_s17, %s39_s23  }
   0xd   : > { %182 = sbr.rel (%p809_p8) target bundleno = 40 (0x28), region = 20 }
  0x12   : > { %185 = sbr.rel (!%p1082_p3) target bundleno = 23 (0x17), region = 24  ;;  %s187_s28 = sand.u32 (%p1082_p3), 1, %s1000_s17  }
  0x13   : > { %s829_s29 = sshll.u32 (%p1082_p3), %s1008_s19, 5  ;;  %s810_s30 = sshll.u32 (%p1082_p3), %s187_s28, 4 }
  0x14   : > { %s193_s7 = scalar_lea.vmem (%p1082_p3), %s1311_s0, %s829_s29  ;;  %s189_s8 = scalar_lea.vmem (%p1082_p3), [#allocation2], %s810_s30 }
  0x15   : > { %v224_v0 = vld [vmem:[%s193_s7] sm:$0xff] (%p1082_p3)  ;;  %v226_v1 = vld [vmem:[%s193_s7 + $0x10] sm:$0xff] (%p1082_p3) }
  0x16   : > { %225 = vst [vmem:[%s189_s8] sm:$0xff] (%p1082_p3), %v224_v0  ;;  %227 = vst [vmem:[%s189_s8 + $0x8] sm:$0xff] (%p1082_p3), %v226_v1 }
  0x17 PF: > { %s234_s9 = sand.u32 1, %s1000_s17   ;;  %s830_s10 = sshll.u32 %s1008_s19, 9 }
  0x18   : > { %s813_s11 = sshll.u32 %s234_s9, 4  ;;  %s711_s14 = scalar_lea.hbm %s1312_s1, %s830_s10 }
  0x19   : > { %s712_s15 = scalar_lea.hbm %s711_s14, 128  ;;  %s238_s21 = scalar_lea.vmem [#allocation3], %s813_s11 }
  0x1a   : > { %s247_s23 = sshll.u32 %s238_s21, 4  ;;  %s235_s25 = scalar_lea.sflag [#allocation4], %s234_s9  ;;  %s248_s23 = int_to_ptr.vmem [resolvable:$true] %s247_s23 }
  0x1b   : > { %s947_s28 = scalar_lea.vmem %s248_s23, 256  ;;  %s1014_s29 = smov [#allocation3]  }
  0x1c   : > { %p948_p9 = scmp.ne.s32.totalorder %s248_s23, %s947_s28  ;;  %s951_s30 = sshll.u32 %s1014_s29, 4  ;;  %s952_s30 = int_to_ptr.vmem [resolvable:$false] %s951_s30 }
  0x1d   : > { %s953_s5 = scalar_lea.vmem %s952_s30, 512  ;;  %p954_p12 = scmp.lt.s32.totalorder %s248_s23, %s952_s30 }
  0x1e   : > { %p949_p10 = pnand %p948_p9, %p1082_p3  ;;  %p955_p13 = scmp.lt.s32.totalorder %s953_s5, %s947_s28 }
  0x20   : > { %p950_p11 = pneg %p949_p10  ;;  %p956_p0 = por %p955_p13, %p954_p12 }
  0x22   : > { %p957_p1 = pnand %p956_p0, %p950_p11 }
  0x24   : > { %960 = shalt.err (!%p957_p1)
}
  0x25   : > { %s1015_s6 = smov 256   ;;  %s1016_s7 = smov 128  }
  0x26   : > { %s1017_s8 = smov 8  }
  0x27   : > { %867 = dma.hbm_to_vmem [thread:$0]  (%p1082_p3), %s712_s15, 256, %s248_s23, %s235_s25, %s1015_s6, %s1016_s7, %s1017_s8  }
  0x28 PF: > { %p816_p2 = scmp.ge.s32.totalorder %s1012_s20, 1  ;;  %p255_p4 = scmp.lt.s32.totalorder %s1012_s20, 3 }
  0x2a   : > { %p256_p5 = pnand %p816_p2, %p255_p4 }
  0x2b   : > { %s262_s9 = sand.u32 (!%p256_p5), 1, %s996_s16  }
  0x2c   : > { %259 = sbr.rel (%p256_p5) target bundleno = 449 (0x1c1), region = 66  ;;  %s817_s10 = sshll.u32 (!%p256_p5), %s262_s9, 4 }
  0x2d   : > { %s264_s11 = scalar_lea.vmem (!%p256_p5), [#allocation2], %s817_s10  ;;  %s269_s12 = scalar_lea.sflag (!%p256_p5), [#allocation4], %s262_s9 }
  0x2e   : > { %s272_s13 = scalar_lea.vmem (!%p256_p5), [#allocation3], %s817_s10 }
  0x31   : > { %987 = dma.done.wait (%p1089_p7), %s269_s12, 256  }
  0x32   : > { %989 = vsyncadd (%p1089_p7), %s269_s12, 4294967040  ;;  %vm356_vm0 = vcmask 261120   ;;  %v330_v2 = vld [vmem:[%s264_s11 + $0x8] sm:$0xff]  ;;  %v329_v3 = vld [vmem:[%s264_s11] sm:$0xff]  ;;  %s1018_s24 = smov 127   ;;  %vm345_vm1 = vcmask 1039360  }
  0x33   : > { %341 = vrot.lane.b32.xlu0 %v330_v2, %s1018_s24  ;;  %337 = vrot.lane.b32.xlu1 %v329_v3, %s1018_s24  ;;  %v350_v4 = vld [vmem:[%s1313_s2] sm:$0xff]  ;;  %v332_v5 = vld [vmem:[%s272_s13 + $0x8] sm:$0xff]  ;;  %p313_p3 = scmp.lt.s32.totalorder %s1004_s18, 1 }
  0x34   : > { %v331_v6 = vld [vmem:[%s272_s13] sm:$0xff]  ;;  %849 = vmatprep.mubr.msk.f32.mxu0 %vm356_vm0, %v350_v4  ;;  %v351_v14 = vld [vmem:[%s1313_s2 + $0x8] sm:$0xff]  ;;  %v353_v15 = vld [vmem:[%s1313_s2 + $0x18] sm:$0xff] }
  0x35   : > { %v352_v7 = vld [vmem:[%s1313_s2 + $0x10] sm:$0xff]  ;;  %v354_v16 = vld [vmem:[%s1313_s2 + $0x20] sm:$0xff]  ;;  %v355_v17 = vld [vmem:[%s1313_s2 + $0x28] sm:$0xff]  ;;  %s1326_s18 = smov (!%p313_p3, %s1004_s18), 1 }
  0x36   : > { %852 = vmatprep.mubr.msk.f32.mxu1 %vm356_vm0, %v352_v7  ;;  %s866_s8 = smul.u32 24, %s1326_s18 }
  0x37   : > { %343 = vrot.lane.b32.xlu0 %v332_v5, %s1018_s24  ;;  %339 = vrot.lane.b32.xlu1 %v331_v6, %s1018_s24 }
  0x38   : > { %s1206_s11 = scalar_lea.vmem %s1314_s3, %s866_s8  ;;  %s1265_s24 = scalar_lea.vmem %s1315_s4, %s866_s8 }
  0xa5   : > { %v342_v8 = vpop.permute.xlu0 %341  ;;  %v338_v9 = vpop.permute.xlu1 %337 }
  0xa9   : > { %v344_v10 = vpop.permute.xlu0 %343  ;;  %v340_v11 = vpop.permute.xlu1 %339 }
  0xaa   : > { %v347_v12 = vsel %vm345_vm1, %v342_v8, %v344_v10  ;;  %v346_v13 = vsel %vm345_vm1, %v338_v9, %v340_v11 }
  0xab   : > { %841 = vmatprep.subr.mxu0 %v347_v12  ;;  %858 = vmatprep.subr.mxu1 %v347_v12 }
  0xac   : > { %842 = vmatpush3.msra.mxu0 %v347_v12  ;;  %862 = vmatpush3.msra.mxu1 %v347_v12 }
  0xad   : > { %843 = vmatprep.subr.mxu0 %v346_v13  ;;  %859 = vmatprep.subr.mxu1 %v346_v13 }
  0xae   : > { %844 = vmatpush3.msra.mxu0 %v346_v13  ;;  %863 = vmatpush3.msra.mxu1 %v346_v13 }
  0xaf   : > { %845 = vmatprep.subr.mxu0 %v330_v2  ;;  %860 = vmatprep.subr.mxu1 %v330_v2 }
  0xb0   : > { %846 = vmatpush3.msra.mxu0 %v330_v2  ;;  %864 = vmatpush3.msra.mxu1 %v330_v2 }
  0xb1   : > { %847 = vmatprep.subr.mxu0 %v329_v3  ;;  %861 = vmatprep.subr.mxu1 %v329_v3 }
  0xb2   : > { %848 = vmatpush3.msra.mxu0 %v329_v3  ;;  %865 = vmatpush3.msra.mxu1 %v329_v3 }
  0xb3   : > { %850 = vmatmul.mubr.msk.f32.vlgmr.msra.gmra.mxu0 %vm356_vm0, %v351_v14  ;;  %853 = vmatmul.mubr.msk.f32.vlgmr.msra.gmra.mxu1 %vm356_vm0, %v353_v15 }
  0xb4   : > { %855 = vmatprep.mubr.msk.f32.mxu1 %vm356_vm0, %v354_v16 }
  0xb7   : > { %856 = vmatmul.mubr.msk.f32.gmra.mxu1 %vm356_vm0, %v355_v17 }
 0x173   : > { %v1144_v18 = vpop.f32.mrf.mxu0  ;;  %v1146_v19 = vpop.f32.mrf.mxu1 }
 0x174   : > { %v473_v22 = vmul.f32 %v1146_v19, %v1146_v19  ;;  %v1155_v23 = vand.u32 2147483647, %v1146_v19  ;;  %v471_v36 = vmul.f32 %v1144_v18, %v1144_v18  ;;  %v1184_v37 = vand.u32 2147483647, %v1144_v18 }
 0x175   : > { %v1148_v20 = vpop.f32.mrf.mxu0  ;;  %v1150_v21 = vpop.f32.mrf.mxu1  ;;  %vm580_vm12 = vcmp.lt.s32.totalorder %v1144_v18, 0  ;;  %vm535_vm13 = vcmp.eq.f32.partialorder %v1146_v19, 0.0  ;;  %vm577_vm15 = vcmp.lt.f32.partialorder %v1144_v18, 0.0  ;;  %vm538_vm0 = vcmp.ne.f32.partialorder %v1146_v19, %v1146_v19 }
 0x176   : > { %v470_v24 = vmul.f32 %v1148_v20, %v1148_v20  ;;  %v1160_v25 = vand.u32 2147483647, %v1148_v20  ;;  %v472_v29 = vmul.f32 %v1150_v21, %v1150_v21  ;;  %v1169_v30 = vand.u32 2147483647, %v1150_v21 }
 0x177   : > { %v1164_v28 = vpop.f32.mrf.mxu1  ;;  %vm533_vm9 = vcmp.lt.s32.totalorder %v1148_v20, 0  ;;  %vm530_vm10 = vcmp.lt.f32.partialorder %v1148_v20, 0.0  ;;  %vm537_vm11 = vcmp.ne.f32.partialorder %v1148_v20, %v1148_v20 }
 0x178   : > { %v476_v26 = vadd.f32 %v473_v22, %v470_v24  ;;  %v506_v27 = vmax.f32 %v1160_v25, %v1155_v23  ;;  %v475_v31 = vmul.f32 %v1164_v28, %v1164_v28  ;;  %v1174_v32 = vand.u32 2147483647, %v1164_v28  ;;  %vm539_vm1 = vmor %vm537_vm11, %vm538_vm0 }
 0x179   : > { %v1176_v33 = vpop.f32.mrf.mxu1  ;;  %v505_v43 = vmin.f32 %v1160_v25, %v1155_v23  ;;  %vm527_vm8 = vcmp.gt.f32.partialorder %v1155_v23, %v1160_v25  ;;  %vm543_vm14 = vcmp.eq.s32.totalorder %v1160_v25, inf  ;;  %vm629_vm11 = vcmp.eq.f32.partialorder %v1164_v28, 0.0 }
 0x17a   : > { %923 = vrsqrt.f32 %v476_v26  ;;  %v478_v34 = vadd.f32 %v475_v31, %v472_v29  ;;  %v600_v35 = vmax.f32 %v1169_v30, %v1174_v32  ;;  %v474_v38 = vmul.f32 %v1176_v33, %v1176_v33 }
 0x17b   : > { %925 = vrcp.f32 %v506_v27  ;;  %v1189_v39 = vand.u32 2147483647, %v1176_v33  ;;  %vm481_vm2 = vcmp.eq.f32.partialorder %v476_v26, inf  ;;  %v484_v46 = vand.u32 2147483648, %v476_v26 }
 0x17c   : > { %927 = vrsqrt.f32 %v478_v34  ;;  %v477_v40 = vadd.f32 %v474_v38, %v471_v36  ;;  %vm483_vm3 = vcmp.eq.f32.partialorder %v476_v26, 0.0  ;;  %v599_v53 = vmin.f32 %v1169_v30, %v1174_v32 }
 0x17d   : > { %929 = vrcp.f32 %v600_v35  ;;  %v553_v41 = vmax.f32 %v1184_v37, %v1189_v39  ;;  %vm495_vm4 = vcmp.eq.f32.partialorder %v478_v34, inf  ;;  %v498_v58 = vand.u32 2147483648, %v478_v34 }
 0x17e   : > { %931 = vrsqrt.f32 %v477_v40  ;;  %vm497_vm5 = vcmp.eq.f32.partialorder %v478_v34, 0.0  ;;  %v552_v61 = vmin.f32 %v1184_v37, %v1189_v39  ;;  %vm488_vm6 = vcmp.eq.f32.partialorder %v477_v40, inf }
 0x17f   : > { %933 = vrcp.f32 %v553_v41  ;;  %v491_v3 = vand.u32 2147483648, %v477_v40  ;;  %vm490_vm7 = vcmp.eq.f32.partialorder %v477_v40, 0.0  ;;  %vm585_vm0 = vcmp.ne.f32.partialorder %v1176_v33, %v1176_v33 }
 0x187   : > { %v924_v42 = vpop.eup %923 }
 0x188   : > { %v926_v44 = vpop.eup %925  ;;  %v480_v45 = vmul.f32 %v924_v42, %v476_v26 }
 0x189   : > { %v1199_v47 = vmul.f32 %v926_v44, %v505_v43  ;;  %v928_v51 = vpop.eup %927 }
 0x18a   : > { %v482_v48 = vsel %vm481_vm2, %v476_v26, %v480_v45  ;;  %v930_v54 = vpop.eup %929  ;;  %v494_v55 = vmul.f32 %v928_v51, %v478_v34  ;;  %vm544_vm2 = vcmp.eq.s32.totalorder %v1155_v23, inf }
 0x18b   : > { %v509_v49 = vmul.f32 %v1199_v47, %v1199_v47  ;;  %v485_v50 = vsel %vm483_vm3, %v484_v46, %v482_v48  ;;  %v1213_v57 = vmul.f32 %v930_v54, %v599_v53  ;;  %v932_v59 = vpop.eup %931  ;;  %vm545_vm3 = vmand %vm543_vm14, %vm544_vm2  ;;  %vm637_vm14 = vcmp.eq.s32.totalorder %v1169_v30, inf }
 0x18c   : > { %500 = vst [vmem:[%s1206_s11] sm:$0xff] %v485_v50  ;;  %v496_v60 = vsel %vm495_vm4, %v478_v34, %v494_v55  ;;  %v934_v62 = vpop.eup %933  ;;  %v487_v1 = vmul.f32 %v932_v59, %v477_v40  ;;  %vm627_vm4 = vcmp.lt.s32.totalorder %v1150_v21, 0  ;;  %vm591_vm2 = vcmp.eq.s32.totalorder %v1189_v39, inf }
 0x18d   : > { %v510_v52 = vmul.f32 0.002785687, %v509_v49  ;;  %v603_v0 = vmul.f32 %v1213_v57, %v1213_v57  ;;  %v499_v2 = vsel %vm497_vm5, %v498_v58, %v496_v60  ;;  %v1220_v4 = vmul.f32 %v934_v62, %v552_v61 }
 0x18e   : > { %502 = vst [vmem:[%s1206_s11 + $0x10] sm:$0x1] %v499_v2  ;;  %v489_v7 = vsel %vm488_vm6, %v477_v40, %v487_v1  ;;  %vm621_vm5 = vcmp.gt.f32.partialorder %v1174_v32, %v1169_v30  ;;  %vm624_vm6 = vcmp.lt.f32.partialorder %v1150_v21, 0.0 }
 0x18f   : > { %v511_v56 = vadd.f32 -0.015866, %v510_v52  ;;  %v604_v6 = vmul.f32 0.002785687, %v603_v0  ;;  %v492_v8 = vsel %vm490_vm7, %v491_v3, %v489_v7  ;;  %v556_v9 = vmul.f32 %v1220_v4, %v1220_v4 }
 0x190   : > { %501 = vst [vmem:[%s1206_s11 + $0x8] sm:$0xff] %v492_v8  ;;  %v1019_v8 = vmov 0.0   ;;  %vm632_vm7 = vcmp.ne.f32.partialorder %v1164_v28, %v1164_v28 }
 0x191   : > { %v512_v63 = vmul.f32 %v511_v56, %v509_v49  ;;  %v605_v11 = vadd.f32 -0.015866, %v604_v6  ;;  %v557_v12 = vmul.f32 0.002785687, %v556_v9 }
 0x193   : > { %v513_v5 = vadd.f32 0.04247222, %v512_v63  ;;  %v606_v14 = vmul.f32 %v605_v11, %v603_v0  ;;  %v558_v15 = vadd.f32 -0.015866, %v557_v12  ;;  %v1020_v12 = vmov 0.7853982  }
 0x195   : > { %v514_v10 = vmul.f32 %v513_v5, %v509_v49  ;;  %v607_v17 = vadd.f32 0.04247222, %v606_v14  ;;  %v559_v22 = vmul.f32 %v558_v15, %v556_v9 }
 0x197   : > { %v515_v13 = vadd.f32 -0.074975304, %v514_v10  ;;  %v608_v26 = vmul.f32 %v607_v17, %v603_v0  ;;  %v560_v27 = vadd.f32 0.04247222, %v559_v22  ;;  %v534_v10 = vsel %vm533_vm9, 3.1415927, %v1019_v8 }
 0x198   : > { %vm638_vm9 = vcmp.eq.s32.totalorder %v1174_v32, inf }
 0x199   : > { %v516_v16 = vmul.f32 %v515_v13, %v509_v49  ;;  %v609_v31 = vadd.f32 -0.074975304, %v608_v26  ;;  %v561_v34 = vmul.f32 %v560_v27, %v556_v9  ;;  %v542_v13 = vsel %vm530_vm10, 2.3561945, %v1020_v12 }
 0x19b   : > { %v517_v24 = vadd.f32 0.1064488, %v516_v16  ;;  %v610_v36 = vmul.f32 %v609_v31, %v603_v0  ;;  %v562_v38 = vadd.f32 -0.074975304, %v561_v34  ;;  %v548_v16 = vand.u32 2147483648, %v1146_v19 }
 0x19c   : > { %v581_v34 = vsel %vm580_vm12, 3.1415927, %v1019_v8  ;;  %vm590_vm12 = vcmp.eq.s32.totalorder %v1184_v37, inf }
 0x19d   : > { %v518_v29 = vmul.f32 %v517_v24, %v509_v49  ;;  %v611_v41 = vadd.f32 0.1064488, %v610_v36  ;;  %v563_v42 = vmul.f32 %v562_v38, %v556_v9  ;;  %v628_v24 = vsel %vm627_vm4, 3.1415927, %v1019_v8 }
 0x19e   : > { %vm584_vm4 = vcmp.ne.f32.partialorder %v1144_v18, %v1144_v18  ;;  %v642_v36 = vand.u32 2147483648, %v1164_v28 }
 0x19f   : > { %v519_v35 = vadd.f32 -0.14207031, %v518_v29  ;;  %v612_v44 = vmul.f32 %v611_v41, %v603_v0  ;;  %v564_v45 = vadd.f32 0.1064488, %v563_v42  ;;  %v636_v29 = vsel %vm624_vm6, 2.3561945, %v1020_v12 }
 0x1a1   : > { %v520_v40 = vmul.f32 %v519_v35, %v509_v49  ;;  %v613_v48 = vadd.f32 -0.14207031, %v612_v44  ;;  %v565_v50 = vmul.f32 %v564_v45, %v556_v9  ;;  %v595_v44 = vand.u32 2147483648, %v1176_v33 }
 0x1a3   : > { %v521_v43 = vadd.f32 0.19993454, %v520_v40  ;;  %v614_v52 = vmul.f32 %v613_v48, %v603_v0  ;;  %v566_v53 = vadd.f32 -0.14207031, %v565_v50 }
 0x1a5   : > { %v522_v46 = vmul.f32 %v521_v43, %v509_v49  ;;  %v615_v55 = vadd.f32 0.19993454, %v614_v52  ;;  %v567_v56 = vmul.f32 %v566_v53, %v556_v9 }
 0x1a7   : > { %v523_v51 = vadd.f32 -0.33333147, %v522_v46  ;;  %v616_v59 = vmul.f32 %v615_v55, %v603_v0  ;;  %v568_v60 = vadd.f32 0.19993454, %v567_v56 }
 0x1a9   : > { %v524_v54 = vmul.f32 %v523_v51, %v509_v49  ;;  %v617_v62 = vadd.f32 -0.33333147, %v616_v59  ;;  %v569_v63 = vmul.f32 %v568_v60, %v556_v9 }
 0x1ab   : > { %v525_v58 = vmul.f32 %v524_v54, %v1199_v47  ;;  %v618_v2 = vmul.f32 %v617_v62, %v603_v0  ;;  %v570_v3 = vadd.f32 -0.33333147, %v569_v63 }
 0x1ad   : > { %v526_v61 = vadd.f32 %v525_v58, %v1199_v47  ;;  %v619_v49 = vmul.f32 %v618_v2, %v1213_v57  ;;  %v571_v47 = vmul.f32 %v570_v3, %v556_v9 }
 0x1af   : > { %v528_v1 = vsub.f32 1.5707964, %v526_v61  ;;  %v620_v0 = vadd.f32 %v619_v49, %v1213_v57  ;;  %v572_v9 = vmul.f32 %v571_v47, %v1220_v4 }
 0x1b1   : > { %v529_v5 = vsel %vm527_vm8, %v528_v1, %v526_v61  ;;  %v622_v57 = vsub.f32 1.5707964, %v620_v0  ;;  %v573_v15 = vadd.f32 %v572_v9, %v1220_v4  ;;  %vm631_vm8 = vcmp.ne.f32.partialorder %v1150_v21, %v1150_v21 }
 0x1b2   : > { %v531_v6 = vsub.f32 3.1415927, %v529_v5 }
 0x1b3   : > { %v623_v20 = vsel %vm621_vm5, %v622_v57, %v620_v0  ;;  %v575_v25 = vsub.f32 1.5707964, %v573_v15  ;;  %vm586_vm5 = vmor %vm584_vm4, %vm585_vm0 }
 0x1b4   : > { %v532_v7 = vsel %vm530_vm10, %v531_v6, %v529_v5  ;;  %v625_v22 = vsub.f32 3.1415927, %v623_v20  ;;  %vm574_vm10 = vcmp.gt.f32.partialorder %v1189_v39, %v1184_v37  ;;  %v589_v39 = vsel %vm577_vm15, 2.3561945, %v1020_v12 }
 0x1b5   : > { %v536_v11 = vsel %vm535_vm13, %v534_v10, %v532_v7  ;;  %v576_v26 = vsel %vm574_vm10, %v575_v25, %v573_v15  ;;  %vm633_vm13 = vmor %vm631_vm8, %vm632_vm7 }
 0x1b6   : > { %v540_v14 = vsel %vm539_vm1, nan, %v536_v11  ;;  %v626_v4 = vsel %vm624_vm6, %v625_v22, %v623_v20  ;;  %v578_v32 = vsub.f32 3.1415927, %v576_v26  ;;  %vm639_vm1 = vmand %vm637_vm14, %vm638_vm9 }
 0x1b7   : > { %v546_v17 = vsel %vm545_vm3, %v542_v13, %v540_v14  ;;  %v630_v27 = vsel %vm629_vm11, %v628_v24, %v626_v4  ;;  %vm582_vm3 = vcmp.eq.f32.partialorder %v1176_v33, 0.0  ;;  %vm592_vm6 = vmand %vm590_vm12, %vm591_vm2 }
 0x1b8   : > { %v547_v23 = vand.u32 2147483647, %v546_v17  ;;  %v634_v31 = vsel %vm633_vm13, nan, %v630_v27  ;;  %v579_v30 = vsel %vm577_vm15, %v578_v32, %v576_v26 }
 0x1b9   : > { %v640_v35 = vsel %vm639_vm1, %v636_v29, %v634_v31  ;;  %v583_v38 = vsel %vm582_vm3, %v581_v34, %v579_v30 }
 0x1ba   : > { %v549_v19 = vor.u32 %v548_v16, %v547_v23  ;;  %v641_v21 = vand.u32 2147483647, %v640_v35  ;;  %v587_v40 = vsel %vm586_vm5, nan, %v583_v38 }
 0x1bb   : > { %v593_v42 = vsel %vm592_vm6, %v589_v39, %v587_v40 }
 0x1bc   : > { %644 = vst [vmem:[%s1265_s24] sm:$0xff] %v549_v19  ;;  %v643_v41 = vor.u32 %v642_v36, %v641_v21  ;;  %v594_v43 = vand.u32 2147483647, %v593_v42 }
 0x1be   : > { %646 = vst [vmem:[%s1265_s24 + $0x10] sm:$0x1] %v643_v41  ;;  %v596_v45 = vor.u32 %v595_v44, %v594_v43 }
 0x1c0   : > { %645 = vst [vmem:[%s1265_s24 + $0x8] sm:$0xff] %v596_v45 }
 0x1c1 PF: > { %s18_s20 = sadd.s32 1, %s1012_s20   ;;  %s1318_s15 = smov %s996_s16 }
 0x1c2   : > { %p15_p6 = scmp.ge.s32.totalorder %s18_s20, 4   ;;  %s1319_s16 = smov %s1000_s17 }
 0x1c3   : > { %s1320_s17 = smov %s1094_s27  ;;  %s1321_s18 = smov %s1008_s19 }
 0x1c4   : > { %s1322_s19 = smov %s1324_s22  ;;  %17 = sbr.rel (!%p15_p6) target bundleno = 4 (0x4), region = 130 }
 0x1c9   :  { %696 = vsyncpa [#allocation4], 1 }
 0x1ca   :  { %698 = vsyncpa [#allocation4 + $0x1], 1 }

</bundles_post_ra>
